<compile_context>
chip_gen: v7x
topology: tpu7x:2x2x1
jax: 0.10.0
libtpu: 0.0.40
codegen_flags: <defaults>
</compile_context>

<pallas_src>
import jax
import jax.numpy as jnp
from jax.experimental import pallas as pl
from jax.experimental.pallas import tpu as pltpu

HW    = 16              # 4x4 spatial positions
C_OUT = 100             # conv output channels
HID   = C_OUT * HW      # 1600 fc input features
OUT   = 169             # fc output features
K_AUG = HW + 1          # 16 spatial inputs + 1 ones-column (folds the conv bias)

N_BATCH = 12            # small demo batch (not a tile multiple -> exercises padding path)


def _round_up(x, m):
    return (x + m - 1) // m * m


def pet_kernel(x_ref, e2_ref, wt_ref, bfc_ref, o_ref):
    # x_ref  : (tb, 17)    bf16  [x_flat | 1]                         (batch-tiled)
    # e2_ref : (17, 1600)  bf16  conv-weight expansion + bias row     (resident)
    # wt_ref : (1600, 169) bf16  fc weight transposed                 (resident)
    # bfc_ref: (1, 169)    f32   fc bias                              (resident)
    # o_ref  : (tb, 169)   f32   softmax output

    # 1x1 conv + bias + PyTorch view(-1,1600) ordering as one bf16 MXU pass:
    #   h[n, c*16+p] = conv_w[c] * x[n,p] + conv_b[c]
    h = jnp.dot(x_ref[...], e2_ref[...], preferred_element_type=jnp.float32)

    # ReLU + downcast fused into one pass -> single bf16 materialisation of h.
    hb = jnp.maximum(h, 0.0).astype(jnp.bfloat16)                # (tb, 1600)

    # Fully-connected layer on the MXU: bf16 inputs, f32 accumulation.
    logits = jnp.dot(hb, wt_ref[...], preferred_element_type=jnp.float32)
    logits = logits + bfc_ref[...]                               # (tb, 169) f32

    # Numerically stable softmax; hoisted exact reciprocal (one per row).
    m = jnp.max(logits, axis=1, keepdims=True)
    e = jnp.exp(logits - m)
    inv = 1.0 / jnp.sum(e, axis=1, keepdims=True)                # (tb, 1)
    o_ref[...] = e * inv


def pet_forward(x_nchw, conv_w, conv_b, fc_w, fc_b, *, block_batch=1024):
    """x_nchw: (N, 1, 4, 4) float32, PyTorch NCHW layout."""
    n = x_nchw.shape[0]
    x_flat = x_nchw.reshape(n, HW).astype(jnp.float32)           # (N, 16), p = h*4+w

    # ----- batch tile selection -----
    n8 = _round_up(n, 8)
    tb = min(max(8, (block_batch // 8) * 8), n8)
    tb = min(tb, 2048)                        # keep well under v7x's 64 MiB physical VMEM
    if n8 >= 512 and tb >= n8:
        # Large batch that would otherwise be one giant tile: split into >=2 tiles so
        # the "parallel" grid axis is sharded across both v7x TensorCores.
        tb = _round_up((n8 + 1) // 2, 256)
    n_pad = _round_up(n, tb)

    # ----- operands -----
    x_aug = jnp.concatenate([x_flat, jnp.ones((n, 1), jnp.float32)], axis=1)  # (N, 17)
    if n_pad != n:
        x_aug = jnp.pad(x_aug, ((0, n_pad - n), (0, 0)))
    x_aug = x_aug.astype(jnp.bfloat16)        # bf16 -> single MXU pass, half the x DMA

    # E2[p, c*16+q] = conv_w[c] * (p == q); extra row 16 holds conv_b repeated per pos.
    w_row = conv_w.reshape(1, C_OUT).astype(jnp.float32)
    e2_w = jnp.kron(w_row, jnp.eye(HW, dtype=jnp.float32))                    # (16, 1600)
    e2_b = jnp.repeat(conv_b.astype(jnp.float32), HW).reshape(1, HID)         # (1, 1600)
    e2 = jnp.concatenate([e2_w, e2_b], axis=0).astype(jnp.bfloat16)           # (17, 1600)

    wt = fc_w.T.astype(jnp.bfloat16)                                          # (1600, 169)
    bfc = fc_b.astype(jnp.float32).reshape(1, OUT)                            # (1, 169)

    grid = (n_pad // tb,)
    cost = pl.CostEstimate(
        flops=2 * n_pad * K_AUG * HID + 2 * n_pad * HID * OUT,
        transcendentals=n_pad * OUT + n_pad,
        bytes_accessed=(x_aug.size * 2 + e2.size * 2 + wt.size * 2
                        + bfc.size * 4 + n_pad * OUT * 4),
    )

    out = pl.pallas_call(
        pet_kernel,
        out_shape=jax.ShapeDtypeStruct((n_pad, OUT), jnp.float32),
        grid=grid,
        in_specs=[
            pl.BlockSpec((tb, K_AUG),  lambda b: (b, 0)),   # x: tiled over batch
            pl.BlockSpec((K_AUG, HID), lambda b: (0, 0)),   # E2 (+bias row): resident
            pl.BlockSpec((HID, OUT),   lambda b: (0, 0)),   # fc weight: resident
            pl.BlockSpec((1, OUT),     lambda b: (0, 0)),   # fc bias: resident
        ],
        out_specs=pl.BlockSpec((tb, OUT), lambda b: (b, 0)),
        compiler_params=pltpu.CompilerParams(
            dimension_semantics=("parallel",),
            vmem_limit_bytes=48 * 1024 * 1024),
        cost_estimate=cost,
    )(x_aug, e2, wt, bfc)

    return out[:n]


def pet_reference(x_nchw, conv_w, conv_b, fc_w, fc_b):
    """Pure-JAX f32 reference mirroring the PyTorch forward."""
    n = x_nchw.shape[0]
    conv = x_nchw[:, 0:1, :, :] * conv_w.reshape(1, C_OUT, 1, 1) \
           + conv_b.reshape(1, C_OUT, 1, 1)
    conv = jnp.maximum(conv, 0.0)
    flat = conv.reshape(n, HID)                 # C-order: c*16 + h*4 + w
    logits = flat @ fc_w.T + fc_b
    return jax.nn.softmax(logits, axis=1)


if __name__ == "__main__":
    key = jax.random.PRNGKey(0)
    k_x, k_cw, k_cb, k_fw, k_fb = jax.random.split(key, 5)

    # Shapes match nn.Conv2d(1, 100, 1) / nn.Linear(1600, 169).
    conv_w = jax.random.normal(k_cw, (C_OUT, 1, 1, 1), dtype=jnp.float32) * 0.1
    conv_b = jax.random.normal(k_cb, (C_OUT,),         dtype=jnp.float32) * 0.1
    fc_w   = jax.random.normal(k_fw, (OUT, HID),       dtype=jnp.float32) * 0.02
    fc_b   = jax.random.normal(k_fb, (OUT,),           dtype=jnp.float32) * 0.02

    # NCHW input like PyTorch: (batch, 1, 4, 4)
    x = jax.random.normal(k_x, (N_BATCH, 1, 4, 4), dtype=jnp.float32)

    ref = pet_reference(x, conv_w, conv_b, fc_w, fc_b)

    # Small tile -> multi-step grid (exercises weight residency + batch padding).
    out = jax.block_until_ready(pet_forward(x, conv_w, conv_b, fc_w, fc_b, block_batch=8))
    assert out.shape == (N_BATCH, OUT)
    assert jnp.allclose(out, ref, atol=2e-3, rtol=2e-2), "mismatch vs reference (tiled grid)"
    assert jnp.allclose(jnp.sum(out, axis=1), 1.0, atol=1e-5), "softmax rows must sum to 1"

    # Default tile (single grid step at this demo size).
    out2 = jax.block_until_ready(pet_forward(x, conv_w, conv_b, fc_w, fc_b))
    assert jnp.allclose(out2, ref, atol=2e-3, rtol=2e-2), "mismatch vs reference (default tile)"
    assert jnp.allclose(jnp.sum(out2, axis=1), 1.0, atol=1e-5), "softmax rows must sum to 1"

    print("KERNEL_OK")
</pallas_src>

<mosaic_0001>
module attributes {stable_mosaic.version = 11 : i64} {
  func.func @pet_kernel(%arg0: i32, %arg1: memref<8x17xbf16, #tpu.memory_space<vmem>>, %arg2: memref<17x1600xbf16, #tpu.memory_space<vmem>>, %arg3: memref<1600x169xbf16, #tpu.memory_space<vmem>>, %arg4: memref<1x169xf32, #tpu.memory_space<vmem>>, %arg5: memref<8x169xf32, #tpu.memory_space<vmem>>) attributes {dimension_semantics = [#tpu.dimension_semantics<parallel>], iteration_bounds = array<i64: 2>, scalar_prefetch = 0 : i64, scratch_operands = 0 : i64, tpu.core_type = #tpu.core_type<tc>, window_params = [{transform_indices = @transform_0, window_bounds = array<i64: 8, 17>}, {pipeline_mode = #tpu.pipeline_mode<synchronous>, transform_indices = @transform_1, window_bounds = array<i64: 17, 1600>}, {pipeline_mode = #tpu.pipeline_mode<synchronous>, transform_indices = @transform_2, window_bounds = array<i64: 1600, 169>}, {pipeline_mode = #tpu.pipeline_mode<synchronous>, transform_indices = @transform_3, window_bounds = array<i64: 1, 169>}, {transform_indices = @transform_4, window_bounds = array<i64: 8, 169>}]} {
    %c0 = arith.constant 0 : index
    %c0_0 = arith.constant 0 : index
    %0 = vector.load %arg1[%c0, %c0_0] : memref<8x17xbf16, #tpu.memory_space<vmem>>, vector<8x17xbf16>
    %c0_1 = arith.constant 0 : index
    %c0_2 = arith.constant 0 : index
    %1 = vector.load %arg2[%c0_1, %c0_2] : memref<17x1600xbf16, #tpu.memory_space<vmem>>, vector<17x1600xbf16>
    %cst = arith.constant dense<0.000000e+00> : vector<8x1600xf32>
    %2 = tpu.matmul %0, %1, %cst {dimension_numbers = #tpu.dot_dimension_numbers<[1], [0], [0], [1], [0, 0, 1, 1], [], []>} : vector<8x17xbf16>, vector<17x1600xbf16>, vector<8x1600xf32> -> vector<8x1600xf32>
    %cst_3 = arith.constant 0.000000e+00 : f32
    %3 = vector.broadcast %cst_3 : f32 to vector<8x1600xf32>
    %4 = arith.maximumf %2, %3 : vector<8x1600xf32>
    %5 = arith.truncf %4 : vector<8x1600xf32> to vector<8x1600xbf16>
    %c0_4 = arith.constant 0 : index
    %c0_5 = arith.constant 0 : index
    %6 = vector.load %arg3[%c0_4, %c0_5] : memref<1600x169xbf16, #tpu.memory_space<vmem>>, vector<1600x169xbf16>
    %cst_6 = arith.constant dense<0.000000e+00> : vector<8x169xf32>
    %7 = tpu.matmul %5, %6, %cst_6 {dimension_numbers = #tpu.dot_dimension_numbers<[1], [0], [0], [1], [0, 0, 1, 1], [], []>} : vector<8x1600xbf16>, vector<1600x169xbf16>, vector<8x169xf32> -> vector<8x169xf32>
    %c0_7 = arith.constant 0 : index
    %c0_8 = arith.constant 0 : index
    %8 = vector.load %arg4[%c0_7, %c0_8] : memref<1x169xf32, #tpu.memory_space<vmem>>, vector<1x169xf32>
    %9 = vector.broadcast %8 : vector<1x169xf32> to vector<8x169xf32>
    %10 = arith.addf %7, %9 : vector<8x169xf32>
    %cst_9 = arith.constant dense<0xFF800000> : vector<8xf32>
    %11 = vector.multi_reduction <maximumf>, %10, %cst_9 [1] : vector<8x169xf32> to vector<8xf32>
    %12 = vector.shape_cast %11 : vector<8xf32> to vector<8x1xf32>
    %13 = vector.broadcast %12 : vector<8x1xf32> to vector<8x169xf32>
    %14 = arith.subf %10, %13 : vector<8x169xf32>
    %15 = math.exp %14 : vector<8x169xf32>
    %cst_10 = arith.constant dense<0.000000e+00> : vector<8xf32>
    %16 = vector.multi_reduction <add>, %15, %cst_10 [1] : vector<8x169xf32> to vector<8xf32>
    %17 = vector.shape_cast %16 : vector<8xf32> to vector<8x1xf32>
    %cst_11 = arith.constant 1.000000e+00 : f32
    %18 = vector.broadcast %cst_11 : f32 to vector<8x1xf32>
    %19 = arith.divf %18, %17 : vector<8x1xf32>
    %20 = vector.broadcast %19 : vector<8x1xf32> to vector<8x169xf32>
    %21 = arith.mulf %15, %20 : vector<8x169xf32>
    %c0_12 = arith.constant 0 : index
    %c0_13 = arith.constant 0 : index
    %22 = vector.load %arg5[%c0_12, %c0_13] : memref<8x169xf32, #tpu.memory_space<vmem>>, vector<8x169xf32>
    tpu.vector_store %arg5[%c0_12, %c0_13], %21 {strides = array<i32>} : memref<8x169xf32, #tpu.memory_space<vmem>>, vector<8x169xf32>,
    return
  }
  func.func @transform_0(%arg0: i32) -> (i32, i32) {
    %c0_i32 = arith.constant 0 : i32
    %c0_i32_0 = arith.constant 0 : i32
    return %arg0, %c0_i32 : i32, i32
  }
  func.func @transform_1(%arg0: i32) -> (i32, i32) {
    %c0_i32 = arith.constant 0 : i32
    %c0_i32_0 = arith.constant 0 : i32
    %c0_i32_1 = arith.constant 0 : i32
    return %c0_i32, %c0_i32_0 : i32, i32
  }
  func.func @transform_2(%arg0: i32) -> (i32, i32) {
    %c0_i32 = arith.constant 0 : i32
    %c0_i32_0 = arith.constant 0 : i32
    %c0_i32_1 = arith.constant 0 : i32
    return %c0_i32, %c0_i32_0 : i32, i32
  }
  func.func @transform_3(%arg0: i32) -> (i32, i32) {
    %c0_i32 = arith.constant 0 : i32
    %c0_i32_0 = arith.constant 0 : i32
    %c0_i32_1 = arith.constant 0 : i32
    return %c0_i32, %c0_i32_0 : i32, i32
  }
  func.func @transform_4(%arg0: i32) -> (i32, i32) {
    %c0_i32 = arith.constant 0 : i32
    %c0_i32_0 = arith.constant 0 : i32
    return %arg0, %c0_i32 : i32, i32
  }
}

</mosaic_0001>

<bundles_post_ra>
// kernel: tpu_custom_call.1
= control target key start
LH: loop header
LB: loop body
LE: loop exit
PB: predicated region body
PF: predicated region fallthrough
CT: control target
= control target key end

     0   :  { %9 = vsyncpa [#allocation3], 0  ;;  %s3851_s0 = inlined_call_operand.vmem [shape: bf16[16,17], index: 0, kind: input, shape index: {}]   ;;  %s3852_s1 = inlined_call_operand.vmem [shape: bf16[17,1600], index: 1, kind: input, shape index: {}]   ;;  %s3853_s2 = inlined_call_operand.vmem [shape: bf16[1600,169], index: 2, kind: input, shape index: {}]   ;;  %s3854_s3 = inlined_call_operand.vmem [shape: f32[1,169], index: 3, kind: input, shape index: {}]   ;;  %s3855_s4 = inlined_call_operand.hbm [shape: f32[16,169], index: 4, kind: output, shape index: {}]  }
   0x1   :  { %11 = vsyncpa [#allocation3 + $0x1], 0  ;;  %s3025_s15 = smov 0   ;;  %s3027_s16 = smov 0  }
   0x2   :  { %s3029_s17 = smov 0   ;;  %s3031_s18 = smov 0  }
   0x3 LB: > { %s3046_s19 = sadd.s32 4294967295, %s2994_s18   ;;  %s2271_s20 = sadd.s32 4294967294, %s2994_s18   ;;  %s2994_s18 = sphi %s3031_s18, %s3861_s18   ;;  %s2990_s17 = sphi %s3029_s17, %s3860_s17   ;;  %s2986_s16 = sphi %s3027_s16, %s3859_s16   ;;  %s2982_s15 = sphi %s3025_s15, %s3858_s15  }
   0x4   : > { %s3050_s21 = sadd.s32 1, %s2994_s18   ;;  %s113_s22 = sadd.s32 1, %s2990_s17 }
   0x5   : > { %s110_s23 = ssub.s32 %s2994_s18, %s3050_s21  ;;  %p123_p0 = scmp.ne.s32.totalorder %s2990_s17, %s2986_s16 }
   0x6   : > { %p111_p1 = scmp.eq.s32.totalorder %s110_s23, 0  ;;  %p124_p2 = scmp.eq.s32.totalorder %s3046_s19, 1 }
   0x7   : > { %p129_p3 = scmp.ne.s32.totalorder %s2986_s16, %s2982_s15  ;;  %p130_p4 = scmp.eq.s32.totalorder %s2271_s20, 1 }
   0x8   : > { %s3061_s24 = scalar_select %p111_p1, %s2990_s17, %s113_s22  }
   0x9   : > { %p3063_p5 = por %p124_p2, %p123_p0  ;;  %p3067_p6 = por %p130_p4, %p129_p3 }
   0xa   : > { %p2274_p7 = scmp.ge.s32.totalorder %s2994_s18, 1  ;;  %p164_p8 = scmp.lt.s32.totalorder %s2994_s18, 3 }
   0xc   : > { %p165_p9 = pnand %p2274_p7, %p164_p8 }
   0xd   : > { %v2594_v0 = vld [vmem:[%s3852_s1 + $0x4] ss:$52 sps:$4 sm:$0xff] (!%p165_p9)   ;;  %vm319_vm0 = vcmask (!%p165_p9), 1040384   ;;  %v2596_v1 = vld [vmem:[%s3852_s1 + $0xc] ss:$52 sps:$4 sm:$0xff] (!%p165_p9)   ;;  %v2996_v2 = vmov (!%p165_p9), 0  }
   0xe   : > { %168 = sbr.rel (%p165_p9) target bundleno = 945 (0x3b1), region = 36  ;;  %v3080_v3 = vsel (!%p165_p9), %vm319_vm0, 65535, %v2996_v2  ;;  %393 = vmatprep.mubr.bf16.mxu0 (!%p165_p9), %v2996_v2  ;;  %434 = vmatprep.mubr.bf16.mxu1 (!%p165_p9), %v2996_v2  ;;  %p189_p10 = scmp.lt.s32.totalorder (!%p165_p9), %s3046_s19, 1  ;;  %v2598_v4 = vld [vmem:[%s3852_s1] ss:$52 sps:$4 sm:$0xff] (!%p165_p9)   ;;  %vm315_vm1 = vcmask (!%p165_p9), 138240  }
   0xf   : > { %361 = vmatprep.subr.bf16.mxu0 (!%p165_p9), %v2594_v0  ;;  %v2599_v5 = vld [vmem:[%s3852_s1 + $0x8] ss:$52 sps:$4 sm:$0xff] (!%p165_p9)   ;;  %402 = vmatprep.subr.bf16.mxu1 (!%p165_p9), %v2596_v1  ;;  %v210_v8 = vld [vmem:[%s3852_s1 + $0x70] sm:$0x11] (!%p165_p9)  ;;  %v212_v12 = vld [vmem:[%s3852_s1 + $0x80] sm:$0x11] (!%p165_p9) }
  0x10   : > { %v209_v6 = vld [vmem:[%s3852_s1 + $0x68] sm:$0x11] (!%p165_p9)  ;;  %362 = vmatpush1.bf16.msra.mxu0 (!%p165_p9), %v2598_v4  ;;  %403 = vmatpush1.bf16.msra.mxu1 (!%p165_p9), %v2599_v5  ;;  %v2293_v10 = vcombine.high (!%p165_p9), %v210_v8, %v210_v8  ;;  %v2292_v11 = vcombine.low (!%p165_p9), %v210_v8, %v210_v8  ;;  %v2606_v15 = vld [vmem:[%s3852_s1 + $0x1c] ss:$52 sps:$4 sm:$0xff] (!%p165_p9)   ;;  %v2297_v18 = vcombine.high (!%p165_p9), %v212_v12, %v212_v12  ;;  %v2616_v33 = vld [vmem:[%s3852_s1 + $0x24] ss:$52 sps:$4 sm:$0xff] (!%p165_p9)  }
  0x11   : > { %v2291_v7 = vcombine.high (!%p165_p9), %v209_v6, %v209_v6  ;;  %v2290_v9 = vcombine.low (!%p165_p9), %v209_v6, %v209_v6  ;;  %v2611_v19 = vld [vmem:[%s3852_s1 + $0x14] ss:$52 sps:$4 sm:$0xff] (!%p165_p9)   ;;  %v211_v20 = vld [vmem:[%s3852_s1 + $0x78] sm:$0x11] (!%p165_p9)  ;;  %v2609_v23 = vld [vmem:[%s3852_s1 + $0x10] ss:$52 sps:$4 sm:$0xff] (!%p165_p9)   ;;  %v2296_v26 = vcombine.low (!%p165_p9), %v212_v12, %v212_v12 }
  0x12   : > { %v332_v16 = vand.u32 (!%p165_p9), %v2293_v10, %v3080_v3  ;;  %v329_v17 = vand.u32 (!%p165_p9), %v2292_v11, %v3080_v3  ;;  %v2295_v21 = vcombine.high (!%p165_p9), %v211_v20, %v211_v20  ;;  %v2294_v24 = vcombine.low (!%p165_p9), %v211_v20, %v211_v20  ;;  %v2604_v25 = vld [vmem:[%s3852_s1 + $0x18] ss:$52 sps:$4 sm:$0xff] (!%p165_p9)   ;;  %v214_v31 = vld [vmem:[%s3852_s1 + $0x90] sm:$0x11] (!%p165_p9)  ;;  %v2619_v40 = vld [vmem:[%s3852_s1 + $0x28] ss:$52 sps:$4 sm:$0xff] (!%p165_p9)  }
  0x13   : > { %v326_v13 = vand.u32 (!%p165_p9), %v2291_v7, %v3080_v3  ;;  %v323_v14 = vand.u32 (!%p165_p9), %v2290_v9, %v3080_v3  ;;  %v344_v27 = vand.u32 (!%p165_p9), %v2297_v18, %v3080_v3  ;;  %v213_v29 = vld [vmem:[%s3852_s1 + $0x88] sm:$0x11] (!%p165_p9)  ;;  %v341_v32 = vand.u32 (!%p165_p9), %v2296_v26, %v3080_v3  ;;  %v2614_v37 = vld [vmem:[%s3852_s1 + $0x20] ss:$52 sps:$4 sm:$0xff] (!%p165_p9)   ;;  %v2624_v45 = vld [vmem:[%s3852_s1 + $0x30] ss:$52 sps:$4 sm:$0xff] (!%p165_p9)  }
  0x14   : > { %404 = vmatprep.subr.bf16.mxu1 (!%p165_p9), %v332_v16  ;;  %v338_v28 = vand.u32 (!%p165_p9), %v2295_v21, %v3080_v3  ;;  %v335_v30 = vand.u32 (!%p165_p9), %v2294_v24, %v3080_v3  ;;  %v2299_v34 = vcombine.high (!%p165_p9), %v213_v29, %v213_v29  ;;  %v2621_v35 = vld [vmem:[%s3852_s1 + $0x2c] ss:$52 sps:$4 sm:$0xff] (!%p165_p9)   ;;  %v2301_v36 = vcombine.high (!%p165_p9), %v214_v31, %v214_v31  ;;  %v2625_v47 = vld [vmem:[%s3852_s1 + $0x98] ss:$0 sps:$4 sm:$0x11] (!%p165_p9)   ;;  %s186_s6 = sand.u32 (!%p165_p9), 1, %s2986_s16  }
  0x15   : > { %s190_s13 = scalar_select %p189_p10, %s3046_s19, 1  ;;  %363 = vmatprep.subr.bf16.mxu0 %v326_v13  ;;  %405 = vmatpush1.bf16.msra.mxu1 %v329_v17  ;;  %v2298_v38 = vcombine.low %v213_v29, %v213_v29  ;;  %v2300_v41 = vcombine.low %v214_v31, %v214_v31  ;;  %v2637_v46 = vld [vmem:[%s3853_s2 + $0x304] ss:$8 sps:$4 sm:$0xff]   ;;  %v2997_v48 = vmov 0.0   ;;  %v2635_v49 = vld [vmem:[%s3853_s2 + $0x300] ss:$8 sps:$4 sm:$0xff]   ;;  %v359_v51 = vand.u32 %v2625_v47, %v3080_v3 }
  0x16   : > { %364 = vmatpush1.bf16.msra.mxu0 %v323_v14  ;;  %484 = vmatprep.subr.bf16.mxu1 %v2606_v15  ;;  %v350_v39 = vand.u32 %v2299_v34, %v3080_v3  ;;  %v356_v42 = vand.u32 %v2301_v36, %v3080_v3  ;;  %v2643_v50 = vld [vmem:[%s3853_s2 + $0x314] ss:$8 sps:$4 sm:$0xff]   ;;  %vm2998_vm2 = vmmov 0   ;;  %v2628_v52 = vld [vmem:[%s3853_s2 + $0x4] ss:$8 sps:$4 sm:$0xff]   ;;  %vm1885_vm3 = vcmask 523264  }
  0x17   : > { %s2276_s22 = sshll.u32 %s190_s13, 2  ;;  %443 = vmatprep.subr.bf16.mxu0 %v2611_v19  ;;  %v347_v43 = vand.u32 %v2298_v38, %v3080_v3  ;;  %v353_v44 = vand.u32 %v2300_v41, %v3080_v3  ;;  %v2641_v53 = vld [vmem:[%s3853_s2 + $0x310] ss:$8 sps:$4 sm:$0xff]   ;;  %v2649_v54 = vld [vmem:[%s3853_s2 + $0x324] ss:$8 sps:$4 sm:$0xff]   ;;  %vm2176_vm4 = vcmask 334848  }
  0x18   : > { %s192_s30 = scalar_lea.vmem %s3851_s0, %s2276_s22  ;;  %v2626_v55 = vld [vmem:[%s3853_s2] ss:$8 sps:$4 sm:$0xff]   ;;  %v2631_v56 = vld [vmem:[%s3853_s2 + $0x14] ss:$8 sps:$4 sm:$0xff]   ;;  %v2629_v59 = vld [vmem:[%s3853_s2 + $0x10] ss:$8 sps:$4 sm:$0xff]  }
  0x19   : > { %v3117_v22 = vld [vmem:[%s192_s30] sm:$0xf]  ;;  %v2655_v58 = vld [vmem:[%s3853_s2 + $0x334] ss:$8 sps:$4 sm:$0xff]   ;;  %v2634_v60 = vld [vmem:[%s3853_s2 + $0x24] ss:$8 sps:$4 sm:$0xff]  }
  0x1a   : > { %2303 = vmatmul.mubr.msk.bf16.vlgmr.msra.gmra.mrb[0].mxu0 %vm315_vm1, %v3117_v22  ;;  %2304 = vmatmul.mubr.msk.bf16.vlgmr.msra.gmra.mrb[0].mxu1 %vm315_vm1, %v3117_v22  ;;  %v2647_v57 = vld [vmem:[%s3853_s2 + $0x320] ss:$8 sps:$4 sm:$0xff]   ;;  %v2653_v61 = vld [vmem:[%s3853_s2 + $0x330] ss:$8 sps:$4 sm:$0xff]   ;;  %v2661_v62 = vld [vmem:[%s3853_s2 + $0x344] ss:$8 sps:$4 sm:$0xff]  }
  0x1b   : > { %444 = vmatpush1.bf16.msra.mxu0 %v2609_v23  ;;  %485 = vmatpush1.bf16.msra.mxu1 %v2604_v25  ;;  %v2632_v63 = vld [vmem:[%s3853_s2 + $0x20] ss:$8 sps:$4 sm:$0xff]   ;;  %v2640_v0 = vld [vmem:[%s3853_s2 + $0x34] ss:$8 sps:$4 sm:$0xff]   ;;  %v2638_v4 = vld [vmem:[%s3853_s2 + $0x30] ss:$8 sps:$4 sm:$0xff]  }
  0x1c   : > { %516 = vmatprep.mubr.bf16.mxu1 %v2996_v2  ;;  %486 = vmatprep.subr.bf16.mxu1 %v344_v27  ;;  %v2659_v1 = vld [vmem:[%s3853_s2 + $0x340] ss:$8 sps:$4 sm:$0xff]   ;;  %v2667_v3 = vld [vmem:[%s3853_s2 + $0x354] ss:$8 sps:$4 sm:$0xff]   ;;  %v2646_v5 = vld [vmem:[%s3853_s2 + $0x44] ss:$8 sps:$4 sm:$0xff]  }
  0x1d   : > { %445 = vmatprep.subr.bf16.mxu0 %v338_v28  ;;  %475 = vmatprep.mubr.bf16.mxu0 %v2996_v2  ;;  %v2644_v6 = vld [vmem:[%s3853_s2 + $0x40] ss:$8 sps:$4 sm:$0xff]   ;;  %v2665_v7 = vld [vmem:[%s3853_s2 + $0x350] ss:$8 sps:$4 sm:$0xff]   ;;  %v2652_v8 = vld [vmem:[%s3853_s2 + $0x54] ss:$8 sps:$4 sm:$0xff]  }
  0x1e   : > { %v2673_v9 = vld [vmem:[%s3853_s2 + $0x364] ss:$8 sps:$4 sm:$0xff]   ;;  %v2671_v10 = vld [vmem:[%s3853_s2 + $0x360] ss:$8 sps:$4 sm:$0xff]   ;;  %v2679_v11 = vld [vmem:[%s3853_s2 + $0x374] ss:$8 sps:$4 sm:$0xff]  }
  0x1f   : > { %446 = vmatpush1.bf16.msra.mxu0 %v335_v30  ;;  %487 = vmatpush1.bf16.msra.mxu1 %v341_v32  ;;  %v2650_v12 = vld [vmem:[%s3853_s2 + $0x50] ss:$8 sps:$4 sm:$0xff]   ;;  %v2658_v13 = vld [vmem:[%s3853_s2 + $0x64] ss:$8 sps:$4 sm:$0xff]   ;;  %v2656_v16 = vld [vmem:[%s3853_s2 + $0x60] ss:$8 sps:$4 sm:$0xff]  }
  0x20   : > { %525 = vmatprep.subr.bf16.mxu0 %v2616_v33  ;;  %566 = vmatprep.subr.bf16.mxu1 %v2621_v35  ;;  %v2677_v14 = vld [vmem:[%s3853_s2 + $0x370] ss:$8 sps:$4 sm:$0xff]   ;;  %v2685_v15 = vld [vmem:[%s3853_s2 + $0x384] ss:$8 sps:$4 sm:$0xff]   ;;  %v2664_v17 = vld [vmem:[%s3853_s2 + $0x74] ss:$8 sps:$4 sm:$0xff]  }
  0x21   : > { %v2683_v18 = vld [vmem:[%s3853_s2 + $0x380] ss:$8 sps:$4 sm:$0xff]   ;;  %v2691_v19 = vld [vmem:[%s3853_s2 + $0x394] ss:$8 sps:$4 sm:$0xff]   ;;  %v2662_v20 = vld [vmem:[%s3853_s2 + $0x70] ss:$8 sps:$4 sm:$0xff]  }
  0x22   : > { %2305 = vmatmul.mubr.msk.bf16.vlgmr.msra.gmra.mrb[4].mxu0 %vm315_vm1, %v3117_v22  ;;  %2306 = vmatmul.mubr.msk.bf16.vlgmr.msra.gmra.mrb[4].mxu1 %vm315_vm1, %v3117_v22  ;;  %v2670_v21 = vld [vmem:[%s3853_s2 + $0x84] ss:$8 sps:$4 sm:$0xff]   ;;  %v2668_v24 = vld [vmem:[%s3853_s2 + $0x80] ss:$8 sps:$4 sm:$0xff]   ;;  %v2676_v25 = vld [vmem:[%s3853_s2 + $0x94] ss:$8 sps:$4 sm:$0xff]  }
  0x23   : > { %526 = vmatpush1.bf16.msra.mxu0 %v2614_v37  ;;  %557 = vmatprep.mubr.bf16.mxu0 %v2996_v2  ;;  %v2697_v23 = vld [vmem:[%s3853_s2 + $0x3a4] ss:$8 sps:$4 sm:$0xff]   ;;  %v2695_v26 = vld [vmem:[%s3853_s2 + $0x3a0] ss:$8 sps:$4 sm:$0xff]   ;;  %v2703_v27 = vld [vmem:[%s3853_s2 + $0x3b4] ss:$8 sps:$4 sm:$0xff]  }
  0x24   : > { %527 = vmatprep.subr.bf16.mxu0 %v350_v39  ;;  %567 = vmatpush1.bf16.msra.mxu1 %v2619_v40  ;;  %v2674_v28 = vld [vmem:[%s3853_s2 + $0x90] ss:$8 sps:$4 sm:$0xff]   ;;  %v2682_v29 = vld [vmem:[%s3853_s2 + $0xa4] ss:$8 sps:$4 sm:$0xff]   ;;  %v2680_v32 = vld [vmem:[%s3853_s2 + $0xa0] ss:$8 sps:$4 sm:$0xff]  }
  0x25   : > { %598 = vmatprep.mubr.bf16.mxu1 %v2996_v2  ;;  %568 = vmatprep.subr.bf16.mxu1 %v356_v42  ;;  %v2701_v30 = vld [vmem:[%s3853_s2 + $0x3b0] ss:$8 sps:$4 sm:$0xff]   ;;  %v2709_v31 = vld [vmem:[%s3853_s2 + $0x3c4] ss:$8 sps:$4 sm:$0xff]   ;;  %v2688_v33 = vld [vmem:[%s3853_s2 + $0xb4] ss:$8 sps:$4 sm:$0xff]  }
  0x26   : > { %v2707_v34 = vld [vmem:[%s3853_s2 + $0x3c0] ss:$8 sps:$4 sm:$0xff]   ;;  %v2686_v35 = vld [vmem:[%s3853_s2 + $0xb0] ss:$8 sps:$4 sm:$0xff]   ;;  %v2694_v36 = vld [vmem:[%s3853_s2 + $0xc4] ss:$8 sps:$4 sm:$0xff]  }
  0x27   : > { %528 = vmatpush1.bf16.msra.mxu0 %v347_v43  ;;  %v2692_v37 = vld [vmem:[%s3853_s2 + $0xc0] ss:$8 sps:$4 sm:$0xff]   ;;  %v2700_v38 = vld [vmem:[%s3853_s2 + $0xd4] ss:$8 sps:$4 sm:$0xff]   ;;  %v2698_v39 = vld [vmem:[%s3853_s2 + $0xd0] ss:$8 sps:$4 sm:$0xff]  }
  0x28   : > { %2520 = vmatprep.subr.bf16.mxu0 %v2997_v48  ;;  %569 = vmatpush1.bf16.msra.mxu1 %v353_v44  ;;  %v2706_v40 = vld [vmem:[%s3853_s2 + $0xe4] ss:$8 sps:$4 sm:$0xff]   ;;  %v2704_v41 = vld [vmem:[%s3853_s2 + $0xe0] ss:$8 sps:$4 sm:$0xff]   ;;  %v2712_v42 = vld [vmem:[%s3853_s2 + $0xf4] ss:$8 sps:$4 sm:$0xff]  }
  0x29   : > { %2012 = vmatprep.subr.bf16.mxu1 %v2637_v46  ;;  %v2715_v43 = vld [vmem:[%s3853_s2 + $0x3d4] ss:$8 sps:$4 sm:$0xff]   ;;  %v2710_v44 = vld [vmem:[%s3853_s2 + $0xf0] ss:$8 sps:$4 sm:$0xff]   ;;  %v2718_v46 = vld [vmem:[%s3853_s2 + $0x104] ss:$8 sps:$4 sm:$0xff]  }
  0x2a   : > { %2307 = vmatmul.mubr.msk.bf16.vlgmr.msra.gmra.mrb[8].mxu0 %vm315_vm1, %v3117_v22  ;;  %v2721_v47 = vld [vmem:[%s3853_s2 + $0x3e4] ss:$8 sps:$4 sm:$0xff]   ;;  %s2275_s7 = sshll.u32 %s186_s6, 4  ;;  %s2516_s8 = sshll.u32 %s3046_s19, 8 }
  0x2b   : > { %2521 = vmatpush3.bf16.msra.mxu0 %v2624_v45  ;;  %2524 = vmatprep.mubr.msk.bf16.mxu0 %vm2998_vm2, %v2997_v48  ;;  %v2713_v45 = vld [vmem:[%s3853_s2 + $0x3d0] ss:$8 sps:$4 sm:$0xff]   ;;  %s188_s9 = scalar_lea.vmem [#allocation2], %s2275_s7  ;;  %s3808_s13 = scalar_lea.hbm %s3855_s4, %s2516_s8 }
  0x2c   : > { %2308 = vmatmul.mubr.msk.bf16.vlgmr.msra.gmra.mrb[8].mxu1 %vm315_vm1, %v3117_v22  ;;  %2522 = vmatprep.subr.bf16.mxu0 %v2997_v48  ;;  %v2719_v48 = vld [vmem:[%s3853_s2 + $0x3e0] ss:$8 sps:$4 sm:$0xff]   ;;  %s2212_s10 = sshll.u32 %s188_s9, 4  ;;  %s2198_s14 = scalar_lea.sflag [#allocation3], %s186_s6  ;;  %s3810_s10 = int_to_ptr.vmem [resolvable:$true] %s2212_s10 }
  0x2d   : > { %2013 = vmatpush1.bf16.msra.mxu1 %v2635_v49  ;;  %v2727_v49 = vld [vmem:[%s3853_s2 + $0x3f4] ss:$8 sps:$4 sm:$0xff]   ;;  %s2932_s19 = scalar_lea.vmem %s3810_s10, 256  ;;  %s2999_s20 = smov [#allocation2]  }
  0x2e   : > { %2014 = vmatprep.subr.bf16.mxu1 %v2643_v50  ;;  %v2725_v50 = vld [vmem:[%s3853_s2 + $0x3f0] ss:$8 sps:$4 sm:$0xff]   ;;  %p2933_p11 = scmp.ne.s32.totalorder %s3810_s10, %s2932_s19  ;;  %s2936_s22 = sshll.u32 %s2999_s20, 4  ;;  %s2937_s22 = int_to_ptr.vmem [resolvable:$false] %s2936_s22 }
  0x2f   : > { %2523 = vmatpush3.bf16.msra.mxu0 %v359_v51  ;;  %v2733_v51 = vld [vmem:[%s3853_s2 + $0x404] ss:$8 sps:$4 sm:$0xff]   ;;  %s2938_s23 = scalar_lea.vmem %s2937_s22, 512  ;;  %p2939_p0 = scmp.lt.s32.totalorder %s3810_s10, %s2937_s22 }
  0x30   : > { %1889 = vmatprep.subr.bf16.mxu0 %v2628_v52  ;;  %p2934_p12 = pnand %p2933_p11, %p3063_p5  ;;  %p2940_p1 = scmp.lt.s32.totalorder %s2938_s23, %s2932_s19 }
  0x31   : > { %2015 = vmatpush1.bf16.msra.mxu1 %v2641_v53 }
  0x32   : > { %2525 = vmatmul.mubr.msk.bf16.vlgmr.msra.gmra.mrb[12].mxu0 %vm315_vm1, %v3117_v22  ;;  %2016 = vmatprep.subr.bf16.mxu1 %v2649_v54  ;;  %v2689_v22 = vld [vmem:[%s3853_s2 + $0x390] ss:$8 sps:$4 sm:$0xff]   ;;  %p2935_p13 = pneg %p2934_p12  ;;  %p2941_p2 = por %p2940_p1, %p2939_p0 }
  0x33   : > { %1890 = vmatpush1.bf16.msra.mxu0 %v2626_v55 }
  0x34   : > { %1891 = vmatprep.subr.bf16.mxu0 %v2631_v56  ;;  %p2942_p3 = pnand %p2941_p2, %p2935_p13 }
  0x35   : > { %2017 = vmatpush1.bf16.msra.mxu1 %v2647_v57 }
  0x36   : > { %2018 = vmatprep.subr.bf16.mxu1 %v2655_v58 }
  0x37   : > { %1892 = vmatpush1.bf16.msra.mxu0 %v2629_v59 }
  0x38   : > { %1893 = vmatprep.subr.bf16.mxu0 %v2634_v60 }
  0x39   : > { %2019 = vmatpush1.bf16.msra.mxu1 %v2653_v61 }
  0x3a   : > { %2020 = vmatprep.subr.bf16.mxu1 %v2661_v62 }
  0x3b   : > { %1894 = vmatpush1.bf16.msra.mxu0 %v2632_v63 }
  0x3c   : > { %1895 = vmatprep.subr.bf16.mxu0 %v2640_v0 }
  0x3d   : > { %2021 = vmatpush1.bf16.msra.mxu1 %v2659_v1  ;;  %v2716_v1 = vld [vmem:[%s3853_s2 + $0x100] ss:$8 sps:$4 sm:$0xff]  }
  0x3e   : > { %2022 = vmatprep.subr.bf16.mxu1 %v2667_v3  ;;  %v2724_v3 = vld [vmem:[%s3853_s2 + $0x114] ss:$8 sps:$4 sm:$0xff]  }
  0x3f   : > { %1896 = vmatpush1.bf16.msra.mxu0 %v2638_v4 }
  0x40   : > { %1897 = vmatprep.subr.bf16.mxu0 %v2646_v5  ;;  %v2722_v5 = vld [vmem:[%s3853_s2 + $0x110] ss:$8 sps:$4 sm:$0xff]  }
  0x41   : > { %2023 = vmatpush1.bf16.msra.mxu1 %v2665_v7 }
  0x42   : > { %2024 = vmatprep.subr.bf16.mxu1 %v2673_v9 }
  0x43   : > { %1898 = vmatpush1.bf16.msra.mxu0 %v2644_v6 }
  0x44   : > { %1899 = vmatprep.subr.bf16.mxu0 %v2652_v8  ;;  %v2730_v8 = vld [vmem:[%s3853_s2 + $0x124] ss:$8 sps:$4 sm:$0xff]  }
  0x45   : > { %2025 = vmatpush1.bf16.msra.mxu1 %v2671_v10 }
  0x46   : > { %2026 = vmatprep.subr.bf16.mxu1 %v2679_v11 }
  0x47   : > { %1900 = vmatpush1.bf16.msra.mxu0 %v2650_v12 }
  0x48   : > { %1901 = vmatprep.subr.bf16.mxu0 %v2658_v13 }
  0x49   : > { %2027 = vmatpush1.bf16.msra.mxu1 %v2677_v14 }
  0x4a   : > { %2028 = vmatprep.subr.bf16.mxu1 %v2685_v15 }
  0x4b   : > { %1902 = vmatpush1.bf16.msra.mxu0 %v2656_v16 }
  0x4c   : > { %1903 = vmatprep.subr.bf16.mxu0 %v2664_v17  ;;  %v2728_v17 = vld [vmem:[%s3853_s2 + $0x120] ss:$8 sps:$4 sm:$0xff]  }
  0x4d   : > { %2029 = vmatpush1.bf16.msra.mxu1 %v2683_v18 }
  0x4e   : > { %2030 = vmatprep.subr.bf16.mxu1 %v2691_v19  ;;  %v2731_v19 = vld [vmem:[%s3853_s2 + $0x400] ss:$8 sps:$4 sm:$0xff]  }
  0x4f   : > { %1904 = vmatpush1.bf16.msra.mxu0 %v2662_v20  ;;  %v2736_v20 = vld [vmem:[%s3853_s2 + $0x134] ss:$8 sps:$4 sm:$0xff]  }
  0x50   : > { %1905 = vmatprep.subr.bf16.mxu0 %v2670_v21 }
  0x51   : > { %2031 = vmatpush1.bf16.msra.mxu1 %v2689_v22  ;;  %v2739_v22 = vld [vmem:[%s3853_s2 + $0x414] ss:$8 sps:$4 sm:$0xff]  }
  0x52   : > { %2032 = vmatprep.subr.bf16.mxu1 %v2697_v23  ;;  %v2734_v23 = vld [vmem:[%s3853_s2 + $0x130] ss:$8 sps:$4 sm:$0xff]  }
  0x53   : > { %1906 = vmatpush1.bf16.msra.mxu0 %v2668_v24 }
  0x54   : > { %1907 = vmatprep.subr.bf16.mxu0 %v2676_v25  ;;  %v2737_v25 = vld [vmem:[%s3853_s2 + $0x410] ss:$8 sps:$4 sm:$0xff]  }
  0x55   : > { %2033 = vmatpush1.bf16.msra.mxu1 %v2695_v26  ;;  %v2742_v26 = vld [vmem:[%s3853_s2 + $0x144] ss:$8 sps:$4 sm:$0xff]  }
  0x56   : > { %2034 = vmatprep.subr.bf16.mxu1 %v2703_v27 }
  0x57   : > { %1908 = vmatpush1.bf16.msra.mxu0 %v2674_v28  ;;  %v2745_v28 = vld [vmem:[%s3853_s2 + $0x424] ss:$8 sps:$4 sm:$0xff]  }
  0x58   : > { %1909 = vmatprep.subr.bf16.mxu0 %v2682_v29 }
  0x59   : > { %2035 = vmatpush1.bf16.msra.mxu1 %v2701_v30 }
  0x5a   : > { %2036 = vmatprep.subr.bf16.mxu1 %v2709_v31 }
  0x5b   : > { %1910 = vmatpush1.bf16.msra.mxu0 %v2680_v32 }
  0x5c   : > { %1911 = vmatprep.subr.bf16.mxu0 %v2688_v33 }
  0x5d   : > { %2037 = vmatpush1.bf16.msra.mxu1 %v2707_v34  ;;  %v2740_v34 = vld [vmem:[%s3853_s2 + $0x140] ss:$8 sps:$4 sm:$0xff]  }
  0x5e   : > { %2038 = vmatprep.subr.bf16.mxu1 %v2715_v43  ;;  %v2749_v43 = vld [vmem:[%s3853_s2 + $0x430] ss:$8 sps:$4 sm:$0xff]  }
  0x5f   : > { %1912 = vmatpush1.bf16.msra.mxu0 %v2686_v35 }
  0x60   : > { %1913 = vmatprep.subr.bf16.mxu0 %v2694_v36 }
  0x61   : > { %2039 = vmatpush1.bf16.msra.mxu1 %v2713_v45 }
  0x62   : > { %2040 = vmatprep.subr.bf16.mxu1 %v2721_v47 }
  0x63   : > { %1914 = vmatpush1.bf16.msra.mxu0 %v2692_v37  ;;  %v2743_v37 = vld [vmem:[%s3853_s2 + $0x420] ss:$8 sps:$4 sm:$0xff]  }
  0x64   : > { %1915 = vmatprep.subr.bf16.mxu0 %v2700_v38  ;;  %v2748_v38 = vld [vmem:[%s3853_s2 + $0x154] ss:$8 sps:$4 sm:$0xff]  }
  0x65   : > { %2041 = vmatpush1.bf16.msra.mxu1 %v2719_v48 }
  0x66   : > { %2042 = vmatprep.subr.bf16.mxu1 %v2727_v49  ;;  %v2752_v49 = vld [vmem:[%s3853_s2 + $0x160] ss:$8 sps:$4 sm:$0xff]  }
  0x67   : > { %1916 = vmatpush1.bf16.msra.mxu0 %v2698_v39 }
  0x68   : > { %1917 = vmatprep.subr.bf16.mxu0 %v2706_v40  ;;  %v2751_v40 = vld [vmem:[%s3853_s2 + $0x434] ss:$8 sps:$4 sm:$0xff]  }
  0x69   : > { %2043 = vmatpush1.bf16.msra.mxu1 %v2725_v50  ;;  %v2755_v50 = vld [vmem:[%s3853_s2 + $0x440] ss:$8 sps:$4 sm:$0xff]  }
  0x6a   : > { %2053 = vmatprep.subr.bf16.mxu1 %v2733_v51  ;;  %v2760_v51 = vld [vmem:[%s3853_s2 + $0x174] ss:$8 sps:$4 sm:$0xff]  }
  0x6b   : > { %1918 = vmatpush1.bf16.msra.mxu0 %v2704_v41  ;;  %v2746_v41 = vld [vmem:[%s3853_s2 + $0x150] ss:$8 sps:$4 sm:$0xff]  }
  0x6c   : > { %1919 = vmatprep.subr.bf16.mxu0 %v2712_v42 }
  0x6f   : > { %1920 = vmatpush1.bf16.msra.mxu0 %v2710_v44  ;;  %v2754_v44 = vld [vmem:[%s3853_s2 + $0x164] ss:$8 sps:$4 sm:$0xff]  }
  0x70   : > { %1930 = vmatprep.subr.bf16.mxu0 %v2718_v46  ;;  %v2757_v46 = vld [vmem:[%s3853_s2 + $0x444] ss:$8 sps:$4 sm:$0xff]  }
  0xed   : > { %v395_v52 = vpop.f32.mrb[0].mxu0  ;;  %v3374_v54 = vpop.f32.mrb[0].mxu1 }
  0xee   : > { %v647_v53 = vmax.f32 %v395_v52, 0.0  ;;  %v397_v55 = vpop.f32.mrb[1].mxu0  ;;  %v438_v57 = vpop.f32.mrb[1].mxu1  ;;  %v2763_v52 = vld [vmem:[%s3853_s2 + $0x454] ss:$8 sps:$4 sm:$0xff]  }
  0xef   : > { %v648_v56 = vmax.f32 %v397_v55, 0.0  ;;  %v399_v58 = vpop.f32.mrb[2].mxu0  ;;  %v650_v60 = vmax.f32 %v438_v57, 0.0  ;;  %v440_v61 = vpop.f32.mrb[2].mxu1  ;;  %v2761_v55 = vld [vmem:[%s3853_s2 + $0x450] ss:$8 sps:$4 sm:$0xff]  }
  0xf0   : > { %v660_v59 = vpack.c.bf16 %v647_v53, %v647_v53  ;;  %v400_v62 = vpop.f32.mrb[3].mxu0  ;;  %v441_v0 = vpop.f32.mrb[3].mxu1  ;;  %v2758_v53 = vld [vmem:[%s3853_s2 + $0x170] ss:$8 sps:$4 sm:$0xff]   ;;  %v2769_v57 = vld [vmem:[%s3853_s2 + $0x464] ss:$8 sps:$4 sm:$0xff]  }
  0xf1   : > { %v661_v63 = vpack.c.bf16 %v648_v56, %v648_v56  ;;  %v663_v4 = vpack.c.bf16 %v650_v60, %v650_v60  ;;  %v2766_v56 = vld [vmem:[%s3853_s2 + $0x184] ss:$8 sps:$4 sm:$0xff]   ;;  %v2764_v58 = vld [vmem:[%s3853_s2 + $0x180] ss:$8 sps:$4 sm:$0xff]   ;;  %v2772_v60 = vld [vmem:[%s3853_s2 + $0x194] ss:$8 sps:$4 sm:$0xff]  }
  0xf2   : > { %v2775_v61 = vld [vmem:[%s3853_s2 + $0x474] ss:$8 sps:$4 sm:$0xff]   ;;  %v2770_v62 = vld [vmem:[%s3853_s2 + $0x190] ss:$8 sps:$4 sm:$0xff]   ;;  %v2778_v0 = vld [vmem:[%s3853_s2 + $0x1a4] ss:$8 sps:$4 sm:$0xff]  }
  0xf3   : > { %1921 = vmatprep.mubr.bf16.mxu0 %v661_v63  ;;  %v2773_v63 = vld [vmem:[%s3853_s2 + $0x470] ss:$8 sps:$4 sm:$0xff]  }
  0xf4   : > { %1922 = vmatmul.mubr.bf16.vlgmr.msra.gmra.mrb[16].mxu0 %v660_v59  ;;  %v2767_v59 = vld [vmem:[%s3853_s2 + $0x460] ss:$8 sps:$4 sm:$0xff]  }
  0xf5   : > { %1931 = vmatpush1.bf16.msra.mxu0 %v2716_v1  ;;  %1962 = vmatprep.mubr.bf16.mxu0 %v663_v4  ;;  %v3385_v6 = vpop.f32.mrb[4].mxu0  ;;  %v518_v7 = vpop.f32.mrb[4].mxu1  ;;  %v2781_v1 = vld [vmem:[%s3853_s2 + $0x484] ss:$8 sps:$4 sm:$0xff]   ;;  %v2779_v4 = vld [vmem:[%s3853_s2 + $0x480] ss:$8 sps:$4 sm:$0xff]  }
  0xf6   : > { %1932 = vmatprep.subr.bf16.mxu0 %v2724_v3  ;;  %v3390_v9 = vpop.f32.mrb[5].mxu0  ;;  %v653_v10 = vmax.f32 %v518_v7, 0.0  ;;  %v520_v11 = vpop.f32.mrb[5].mxu1  ;;  %v2776_v3 = vld [vmem:[%s3853_s2 + $0x1a0] ss:$8 sps:$4 sm:$0xff]  }
  0xf7   : > { %v481_v12 = vpop.f32.mrb[6].mxu0  ;;  %v654_v13 = vmax.f32 %v520_v11, 0.0  ;;  %v522_v14 = vpop.f32.mrb[6].mxu1  ;;  %v2787_v7 = vld [vmem:[%s3853_s2 + $0x494] ss:$8 sps:$4 sm:$0xff]  }
  0xf8   : > { %v482_v15 = vpop.f32.mrb[7].mxu0  ;;  %v523_v16 = vpop.f32.mrb[7].mxu1  ;;  %v666_v21 = vpack.c.bf16 %v653_v10, %v653_v10  ;;  %v2785_v10 = vld [vmem:[%s3853_s2 + $0x490] ss:$8 sps:$4 sm:$0xff]   ;;  %v2790_v11 = vld [vmem:[%s3853_s2 + $0x1c4] ss:$8 sps:$4 sm:$0xff]  }
  0xf9   : > { %1933 = vmatpush1.bf16.msra.mxu0 %v2722_v5  ;;  %v667_v18 = vpack.c.bf16 %v654_v13, %v654_v13  ;;  %v2784_v5 = vld [vmem:[%s3853_s2 + $0x1b4] ss:$8 sps:$4 sm:$0xff]   ;;  %v2793_v12 = vld [vmem:[%s3853_s2 + $0x4a4] ss:$8 sps:$4 sm:$0xff]   ;;  %v2788_v13 = vld [vmem:[%s3853_s2 + $0x1c0] ss:$8 sps:$4 sm:$0xff]  }
  0xfa   : > { %1934 = vmatprep.subr.bf16.mxu0 %v2730_v8  ;;  %v2782_v8 = vld [vmem:[%s3853_s2 + $0x1b0] ss:$8 sps:$4 sm:$0xff]   ;;  %v2791_v14 = vld [vmem:[%s3853_s2 + $0x4a0] ss:$8 sps:$4 sm:$0xff]   ;;  %v2796_v15 = vld [vmem:[%s3853_s2 + $0x1d4] ss:$8 sps:$4 sm:$0xff]  }
  0xfb   : > { %2044 = vmatprep.mubr.bf16.mxu1 %v667_v18  ;;  %v2799_v16 = vld [vmem:[%s3853_s2 + $0x4b4] ss:$8 sps:$4 sm:$0xff]   ;;  %v2797_v18 = vld [vmem:[%s3853_s2 + $0x4b0] ss:$8 sps:$4 sm:$0xff]  }
  0xfc   : > { %2045 = vmatmul.mubr.bf16.vlgmr.msra.gmra.mrb[12].mxu1 %v666_v21  ;;  %v2800_v21 = vld [vmem:[%s3853_s2 + $0x1e0] ss:$8 sps:$4 sm:$0xff]  }
  0xfd   : > { %1935 = vmatpush1.bf16.msra.mxu0 %v2728_v17  ;;  %v3407_v24 = vpop.f32.mrb[8].mxu0  ;;  %2054 = vmatpush1.bf16.msra.mxu1 %v2731_v19  ;;  %v2794_v17 = vld [vmem:[%s3853_s2 + $0x1d0] ss:$8 sps:$4 sm:$0xff]   ;;  %v2802_v19 = vld [vmem:[%s3853_s2 + $0x1e4] ss:$8 sps:$4 sm:$0xff]  }
  0xfe   : > { %1936 = vmatprep.subr.bf16.mxu0 %v2736_v20  ;;  %v561_v27 = vpop.f32.mrb[9].mxu0  ;;  %2055 = vmatprep.subr.bf16.mxu1 %v2739_v22  ;;  %v2805_v20 = vld [vmem:[%s3853_s2 + $0x4c4] ss:$8 sps:$4 sm:$0xff]   ;;  %v2803_v22 = vld [vmem:[%s3853_s2 + $0x4c0] ss:$8 sps:$4 sm:$0xff]  }
  0xff   : > { %v656_v29 = vmax.f32 %v561_v27, 0.0  ;;  %v563_v30 = vpop.f32.mrb[10].mxu0  ;;  %v3418_v31 = vpop.f32.mrb[8].mxu1  ;;  %v649_v27 = vmax.f32 %v3374_v54, 0.0  ;;  %v2812_v54 = vld [vmem:[%s3853_s2 + $0x200] ss:$8 sps:$4 sm:$0xff]  }
 0x100   : > { %v564_v32 = vpop.f32.mrb[11].mxu0  ;;  %v3420_v33 = vpop.f32.mrb[9].mxu1  ;;  %v652_v30 = vmax.f32 %v3390_v9, 0.0  ;;  %v2820_v9 = vld [vmem:[%s3853_s2 + $0x214] ss:$8 sps:$4 sm:$0xff]  }
 0x101   : > { %1937 = vmatpush1.bf16.msra.mxu0 %v2734_v23  ;;  %v669_v35 = vpack.c.bf16 %v656_v29, %v656_v29  ;;  %v604_v36 = vpop.f32.mrb[10].mxu1  ;;  %2056 = vmatpush1.bf16.msra.mxu1 %v2737_v25  ;;  %v2808_v23 = vld [vmem:[%s3853_s2 + $0x1f4] ss:$8 sps:$4 sm:$0xff]   ;;  %v2814_v29 = vld [vmem:[%s3853_s2 + $0x204] ss:$8 sps:$4 sm:$0xff]  }
 0x102   : > { %1938 = vmatprep.subr.bf16.mxu0 %v2742_v26  ;;  %v605_v39 = vpop.f32.mrb[11].mxu1  ;;  %2057 = vmatprep.subr.bf16.mxu1 %v2745_v28  ;;  %v2811_v25 = vld [vmem:[%s3853_s2 + $0x4d4] ss:$8 sps:$4 sm:$0xff]   ;;  %v2806_v26 = vld [vmem:[%s3853_s2 + $0x1f0] ss:$8 sps:$4 sm:$0xff]   ;;  %v665_v36 = vpack.c.bf16 %v652_v30, %v652_v30 }
 0x103   : > { %2085 = vmatprep.mubr.bf16.mxu1 %v669_v35  ;;  %v2809_v28 = vld [vmem:[%s3853_s2 + $0x4d0] ss:$8 sps:$4 sm:$0xff]   ;;  %v2817_v32 = vld [vmem:[%s3853_s2 + $0x4e4] ss:$8 sps:$4 sm:$0xff]   ;;  %v2815_v35 = vld [vmem:[%s3853_s2 + $0x4e0] ss:$8 sps:$4 sm:$0xff]  }
 0x104   : > { %v2818_v39 = vld [vmem:[%s3853_s2 + $0x210] ss:$8 sps:$4 sm:$0xff]  }
 0x105   : > { %1939 = vmatpush1.bf16.msra.mxu0 %v2740_v34  ;;  %v3437_v42 = vpop.f32.mrb[12].mxu0  ;;  %2058 = vmatpush1.bf16.msra.mxu1 %v2743_v37  ;;  %v662_v34 = vpack.c.bf16 %v649_v27, %v649_v27  ;;  %v2823_v37 = vld [vmem:[%s3853_s2 + $0x4f4] ss:$8 sps:$4 sm:$0xff]   ;;  %v2887_v27 = vld [vmem:[%s3853_s2 + $0x5a0] ss:$8 sps:$4 sm:$0xff]  }
 0x106   : > { %1940 = vmatprep.subr.bf16.mxu0 %v2748_v38  ;;  %v2526_v45 = vpop.f32.mrb[13].mxu0  ;;  %2059 = vmatprep.subr.bf16.mxu1 %v2751_v40  ;;  %v655_v38 = vmax.f32 %v3407_v24, 0.0  ;;  %v2821_v40 = vld [vmem:[%s3853_s2 + $0x4f0] ss:$8 sps:$4 sm:$0xff]   ;;  %v2829_v24 = vld [vmem:[%s3853_s2 + $0x504] ss:$8 sps:$4 sm:$0xff]  }
 0x107   : > { %v644_v47 = vpop.f32.mrb[14].mxu0  ;;  %v2824_v45 = vld [vmem:[%s3853_s2 + $0x220] ss:$8 sps:$4 sm:$0xff]   ;;  %v2890_v30 = vld [vmem:[%s3853_s2 + $0x2d0] ss:$8 sps:$4 sm:$0xff]  }
 0x108   : > { %v2527_v48 = vpop.f32.mrb[15].mxu0  ;;  %v2832_v47 = vld [vmem:[%s3853_s2 + $0x234] ss:$8 sps:$4 sm:$0xff]  }
 0x109   : > { %1941 = vmatpush1.bf16.msra.mxu0 %v2746_v41  ;;  %2060 = vmatpush1.bf16.msra.mxu1 %v2749_v43  ;;  %v2826_v41 = vld [vmem:[%s3853_s2 + $0x224] ss:$8 sps:$4 sm:$0xff]   ;;  %v658_v43 = vmax.f32 %v3420_v33, 0.0  ;;  %v2835_v33 = vld [vmem:[%s3853_s2 + $0x514] ss:$8 sps:$4 sm:$0xff]  }
 0x10a   : > { %1942 = vmatprep.subr.bf16.mxu0 %v2754_v44  ;;  %2061 = vmatprep.subr.bf16.mxu1 %v2757_v46  ;;  %v668_v44 = vpack.c.bf16 %v655_v38, %v655_v38  ;;  %v2827_v46 = vld [vmem:[%s3853_s2 + $0x500] ss:$8 sps:$4 sm:$0xff]   ;;  %v2902_v38 = vld [vmem:[%s3853_s2 + $0x2f0] ss:$8 sps:$4 sm:$0xff]  }
 0x10b   : > { %v671_v48 = vpack.c.bf16 %v658_v43, %v658_v43  ;;  %v2908_v43 = vld [vmem:[%s3853_s2 + $0x5e0] ss:$8 sps:$4 sm:$0xff]  }
 0x10d   : > { %1943 = vmatpush1.bf16.msra.mxu0 %v2752_v49  ;;  %2062 = vmatpush1.bf16.msra.mxu1 %v2755_v50  ;;  %v2830_v49 = vld [vmem:[%s3853_s2 + $0x230] ss:$8 sps:$4 sm:$0xff]  }
 0x10e   : > { %1944 = vmatprep.subr.bf16.mxu0 %v2760_v51  ;;  %2063 = vmatprep.subr.bf16.mxu1 %v2763_v52  ;;  %v2833_v50 = vld [vmem:[%s3853_s2 + $0x510] ss:$8 sps:$4 sm:$0xff]   ;;  %v2838_v51 = vld [vmem:[%s3853_s2 + $0x244] ss:$8 sps:$4 sm:$0xff]  }
 0x10f   : > { %v2841_v52 = vld [vmem:[%s3853_s2 + $0x524] ss:$8 sps:$4 sm:$0xff]  }
 0x111   : > { %1945 = vmatpush1.bf16.msra.mxu0 %v2758_v53  ;;  %2064 = vmatpush1.bf16.msra.mxu1 %v2761_v55  ;;  %v2836_v53 = vld [vmem:[%s3853_s2 + $0x240] ss:$8 sps:$4 sm:$0xff]  }
 0x112   : > { %1946 = vmatprep.subr.bf16.mxu0 %v2766_v56  ;;  %2065 = vmatprep.subr.bf16.mxu1 %v2769_v57  ;;  %v2839_v55 = vld [vmem:[%s3853_s2 + $0x520] ss:$8 sps:$4 sm:$0xff]   ;;  %v2844_v56 = vld [vmem:[%s3853_s2 + $0x254] ss:$8 sps:$4 sm:$0xff]  }
 0x113   : > { %v2847_v57 = vld [vmem:[%s3853_s2 + $0x534] ss:$8 sps:$4 sm:$0xff]  }
 0x115   : > { %1947 = vmatpush1.bf16.msra.mxu0 %v2764_v58  ;;  %2066 = vmatpush1.bf16.msra.mxu1 %v2767_v59  ;;  %v2842_v58 = vld [vmem:[%s3853_s2 + $0x250] ss:$8 sps:$4 sm:$0xff]  }
 0x116   : > { %1948 = vmatprep.subr.bf16.mxu0 %v2772_v60  ;;  %2067 = vmatprep.subr.bf16.mxu1 %v2775_v61  ;;  %v2845_v59 = vld [vmem:[%s3853_s2 + $0x530] ss:$8 sps:$4 sm:$0xff]   ;;  %v2850_v60 = vld [vmem:[%s3853_s2 + $0x264] ss:$8 sps:$4 sm:$0xff]  }
 0x117   : > { %v2853_v61 = vld [vmem:[%s3853_s2 + $0x544] ss:$8 sps:$4 sm:$0xff]  }
 0x119   : > { %1949 = vmatpush1.bf16.msra.mxu0 %v2770_v62  ;;  %2068 = vmatpush1.bf16.msra.mxu1 %v2773_v63  ;;  %v2848_v62 = vld [vmem:[%s3853_s2 + $0x260] ss:$8 sps:$4 sm:$0xff]  }
 0x11a   : > { %1950 = vmatprep.subr.bf16.mxu0 %v2778_v0  ;;  %2069 = vmatprep.subr.bf16.mxu1 %v2781_v1  ;;  %v2851_v63 = vld [vmem:[%s3853_s2 + $0x540] ss:$8 sps:$4 sm:$0xff]   ;;  %v2856_v0 = vld [vmem:[%s3853_s2 + $0x274] ss:$8 sps:$4 sm:$0xff]  }
 0x11b   : > { %v2859_v1 = vld [vmem:[%s3853_s2 + $0x554] ss:$8 sps:$4 sm:$0xff]  }
 0x11d   : > { %1951 = vmatpush1.bf16.msra.mxu0 %v2776_v3  ;;  %2070 = vmatpush1.bf16.msra.mxu1 %v2779_v4  ;;  %v2854_v3 = vld [vmem:[%s3853_s2 + $0x270] ss:$8 sps:$4 sm:$0xff]  }
 0x11e   : > { %1952 = vmatprep.subr.bf16.mxu0 %v2784_v5  ;;  %2071 = vmatprep.subr.bf16.mxu1 %v2787_v7  ;;  %v2857_v4 = vld [vmem:[%s3853_s2 + $0x550] ss:$8 sps:$4 sm:$0xff]   ;;  %v2862_v5 = vld [vmem:[%s3853_s2 + $0x284] ss:$8 sps:$4 sm:$0xff]  }
 0x11f   : > { %v2865_v7 = vld [vmem:[%s3853_s2 + $0x564] ss:$8 sps:$4 sm:$0xff]  }
 0x121   : > { %1953 = vmatpush1.bf16.msra.mxu0 %v2782_v8  ;;  %2072 = vmatpush1.bf16.msra.mxu1 %v2785_v10  ;;  %v2860_v8 = vld [vmem:[%s3853_s2 + $0x280] ss:$8 sps:$4 sm:$0xff]  }
 0x122   : > { %1954 = vmatprep.subr.bf16.mxu0 %v2790_v11  ;;  %2073 = vmatprep.subr.bf16.mxu1 %v2793_v12  ;;  %v2863_v10 = vld [vmem:[%s3853_s2 + $0x560] ss:$8 sps:$4 sm:$0xff]   ;;  %v2868_v11 = vld [vmem:[%s3853_s2 + $0x294] ss:$8 sps:$4 sm:$0xff]  }
 0x123   : > { %v2871_v12 = vld [vmem:[%s3853_s2 + $0x574] ss:$8 sps:$4 sm:$0xff]  }
 0x125   : > { %1955 = vmatpush1.bf16.msra.mxu0 %v2788_v13  ;;  %2074 = vmatpush1.bf16.msra.mxu1 %v2791_v14  ;;  %v2866_v13 = vld [vmem:[%s3853_s2 + $0x290] ss:$8 sps:$4 sm:$0xff]  }
 0x126   : > { %1956 = vmatprep.subr.bf16.mxu0 %v2796_v15  ;;  %2075 = vmatprep.subr.bf16.mxu1 %v2799_v16  ;;  %v2869_v14 = vld [vmem:[%s3853_s2 + $0x570] ss:$8 sps:$4 sm:$0xff]   ;;  %v2874_v15 = vld [vmem:[%s3853_s2 + $0x2a4] ss:$8 sps:$4 sm:$0xff]  }
 0x127   : > { %v2877_v16 = vld [vmem:[%s3853_s2 + $0x584] ss:$8 sps:$4 sm:$0xff]  }
 0x129   : > { %1957 = vmatpush1.bf16.msra.mxu0 %v2794_v17  ;;  %2076 = vmatpush1.bf16.msra.mxu1 %v2797_v18  ;;  %v2872_v17 = vld [vmem:[%s3853_s2 + $0x2a0] ss:$8 sps:$4 sm:$0xff]  }
 0x12a   : > { %1958 = vmatprep.subr.bf16.mxu0 %v2802_v19  ;;  %2077 = vmatprep.subr.bf16.mxu1 %v2805_v20  ;;  %v2875_v18 = vld [vmem:[%s3853_s2 + $0x580] ss:$8 sps:$4 sm:$0xff]   ;;  %v2880_v19 = vld [vmem:[%s3853_s2 + $0x2b4] ss:$8 sps:$4 sm:$0xff]  }
 0x12b   : > { %v2883_v20 = vld [vmem:[%s3853_s2 + $0x594] ss:$8 sps:$4 sm:$0xff]  }
 0x12d   : > { %1959 = vmatpush1.bf16.msra.mxu0 %v2800_v21  ;;  %2078 = vmatpush1.bf16.msra.mxu1 %v2803_v22  ;;  %v2878_v21 = vld [vmem:[%s3853_s2 + $0x2b0] ss:$8 sps:$4 sm:$0xff]  }
 0x12e   : > { %1960 = vmatprep.subr.bf16.mxu0 %v2808_v23  ;;  %2079 = vmatprep.subr.bf16.mxu1 %v2811_v25  ;;  %v2881_v22 = vld [vmem:[%s3853_s2 + $0x590] ss:$8 sps:$4 sm:$0xff]   ;;  %v2886_v23 = vld [vmem:[%s3853_s2 + $0x2c4] ss:$8 sps:$4 sm:$0xff]  }
 0x12f   : > { %v2889_v25 = vld [vmem:[%s3853_s2 + $0x5a4] ss:$8 sps:$4 sm:$0xff]  }
 0x131   : > { %1961 = vmatpush1.bf16.msra.mxu0 %v2806_v26  ;;  %2080 = vmatpush1.bf16.msra.mxu1 %v2809_v28  ;;  %v2884_v26 = vld [vmem:[%s3853_s2 + $0x2c0] ss:$8 sps:$4 sm:$0xff]   ;;  %v2892_v28 = vld [vmem:[%s3853_s2 + $0x2d4] ss:$8 sps:$4 sm:$0xff]  }
 0x132   : > { %1971 = vmatprep.subr.bf16.mxu0 %v2814_v29  ;;  %2081 = vmatprep.subr.bf16.mxu1 %v2817_v32  ;;  %v2895_v29 = vld [vmem:[%s3853_s2 + $0x5b4] ss:$8 sps:$4 sm:$0xff]   ;;  %v2893_v32 = vld [vmem:[%s3853_s2 + $0x5b0] ss:$8 sps:$4 sm:$0xff]  }
 0x134   : > { %1963 = vmatmul.mubr.bf16.vlgmr.msra.gmra.mrb[16].mxu0 %v662_v34  ;;  %v2901_v34 = vld [vmem:[%s3853_s2 + $0x5c4] ss:$8 sps:$4 sm:$0xff]  }
 0x135   : > { %1972 = vmatpush1.bf16.msra.mxu0 %v2812_v54  ;;  %2003 = vmatprep.mubr.bf16.mxu0 %v665_v36  ;;  %v2898_v54 = vld [vmem:[%s3853_s2 + $0x2e4] ss:$8 sps:$4 sm:$0xff]   ;;  %v2904_v36 = vld [vmem:[%s3853_s2 + $0x2f4] ss:$8 sps:$4 sm:$0xff]  }
 0x136   : > { %2082 = vmatpush1.bf16.msra.mxu1 %v2815_v35  ;;  %1973 = vmatprep.subr.bf16.mxu0 %v2820_v9  ;;  %v2896_v35 = vld [vmem:[%s3853_s2 + $0x2e0] ss:$8 sps:$4 sm:$0xff]  }
 0x137   : > { %2083 = vmatprep.subr.bf16.mxu1 %v2823_v37  ;;  %v2899_v9 = vld [vmem:[%s3853_s2 + $0x5c0] ss:$8 sps:$4 sm:$0xff]   ;;  %v2907_v37 = vld [vmem:[%s3853_s2 + $0x5d4] ss:$8 sps:$4 sm:$0xff]  }
 0x139   : > { %1974 = vmatpush1.bf16.msra.mxu0 %v2818_v39  ;;  %v651_v39 = vmax.f32 %v3385_v6, 0.0  ;;  %v2913_v6 = vld [vmem:[%s3853_s2 + $0x5f4] ss:$8 sps:$4 sm:$0xff]  }
 0x13a   : > { %2084 = vmatpush1.bf16.msra.mxu1 %v2821_v40  ;;  %1975 = vmatprep.subr.bf16.mxu0 %v2826_v41  ;;  %v2905_v40 = vld [vmem:[%s3853_s2 + $0x5d0] ss:$8 sps:$4 sm:$0xff]   ;;  %v2910_v41 = vld [vmem:[%s3853_s2 + $0x5e4] ss:$8 sps:$4 sm:$0xff]  }
 0x13b   : > { %2094 = vmatprep.subr.bf16.mxu1 %v2829_v24  ;;  %v664_v24 = vpack.c.bf16 %v651_v39, %v651_v39 }
 0x13d   : > { %2086 = vmatmul.mubr.bf16.vlgmr.msra.gmra.mrb[12].mxu1 %v668_v44  ;;  %1976 = vmatpush1.bf16.msra.mxu0 %v2824_v45  ;;  %v657_v44 = vmax.f32 %v3418_v31, 0.0  ;;  %v2911_v45 = vld [vmem:[%s3853_s2 + $0x5f0] ss:$8 sps:$4 sm:$0xff]   ;;  %v2919_v31 = vld [vmem:[%s3853_s2 + $0x614] ss:$8 sps:$4 sm:$0xff]  }
 0x13e   : > { %2095 = vmatpush1.bf16.msra.mxu1 %v2827_v46  ;;  %1977 = vmatprep.subr.bf16.mxu0 %v2832_v47  ;;  %v2916_v46 = vld [vmem:[%s3853_s2 + $0x604] ss:$8 sps:$4 sm:$0xff]  }
 0x13f   : > { %2096 = vmatprep.subr.bf16.mxu1 %v2835_v33  ;;  %2126 = vmatprep.mubr.bf16.mxu1 %v671_v48  ;;  %v670_v47 = vpack.c.bf16 %v657_v44, %v657_v44  ;;  %v2914_v33 = vld [vmem:[%s3853_s2 + $0x600] ss:$8 sps:$4 sm:$0xff]   ;;  %v2917_v48 = vld [vmem:[%s3853_s2 + $0x610] ss:$8 sps:$4 sm:$0xff]  }
 0x141   : > { %1978 = vmatpush1.bf16.msra.mxu0 %v2830_v49  ;;  %v2922_v49 = vld [vmem:[%s3853_s2 + $0x624] ss:$8 sps:$4 sm:$0xff]  }
 0x142   : > { %2097 = vmatpush1.bf16.msra.mxu1 %v2833_v50  ;;  %1979 = vmatprep.subr.bf16.mxu0 %v2838_v51  ;;  %v2920_v50 = vld [vmem:[%s3853_s2 + $0x620] ss:$8 sps:$4 sm:$0xff]   ;;  %v2925_v51 = vld [vmem:[%s3853_s2 + $0x634] ss:$8 sps:$4 sm:$0xff]  }
 0x143   : > { %2098 = vmatprep.subr.bf16.mxu1 %v2841_v52  ;;  %v659_v52 = vmax.f32 %v3437_v42, 0.0  ;;  %v873_v42 = vld [vmem:[%s3854_s3] sm:$0x3] }
 0x145   : > { %1980 = vmatpush1.bf16.msra.mxu0 %v2836_v53  ;;  %v672_v53 = vpack.c.bf16 %v659_v52, %v659_v52 }
 0x146   : > { %2099 = vmatpush1.bf16.msra.mxu1 %v2839_v55  ;;  %1981 = vmatprep.subr.bf16.mxu0 %v2844_v56 }
 0x147   : > { %2100 = vmatprep.subr.bf16.mxu1 %v2847_v57 }
 0x149   : > { %1982 = vmatpush1.bf16.msra.mxu0 %v2842_v58 }
 0x14a   : > { %2101 = vmatpush1.bf16.msra.mxu1 %v2845_v59  ;;  %1983 = vmatprep.subr.bf16.mxu0 %v2850_v60  ;;  %v875_v59 = vlaneseq }
 0x14b   : > { %2102 = vmatprep.subr.bf16.mxu1 %v2853_v61 }
 0x14c   : > { %v876_v60 = vshrl.u32 %v875_v59, 7 }
 0x14d   : > { %1984 = vmatpush1.bf16.msra.mxu0 %v2848_v62 }
 0x14e   : > { %2103 = vmatpush1.bf16.msra.mxu1 %v2851_v63  ;;  %1985 = vmatprep.subr.bf16.mxu0 %v2856_v0  ;;  %v877_v61 = vsub.s32 0, %v876_v60  ;;  %v881_v62 = vsub.s32 1, %v876_v60 }
 0x14f   : > { %2104 = vmatprep.subr.bf16.mxu1 %v2859_v1 }
 0x150   : > { %v878_v63 = vrot.slane %v873_v42, %v877_v61  ;;  %v882_v0 = vrot.slane %v873_v42, %v881_v62 }
 0x151   : > { %1986 = vmatpush1.bf16.msra.mxu0 %v2854_v3 }
 0x152   : > { %2105 = vmatpush1.bf16.msra.mxu1 %v2857_v4  ;;  %1987 = vmatprep.subr.bf16.mxu0 %v2862_v5 }
 0x153   : > { %2106 = vmatprep.subr.bf16.mxu1 %v2865_v7 }
 0x155   : > { %1988 = vmatpush1.bf16.msra.mxu0 %v2860_v8 }
 0x156   : > { %2107 = vmatpush1.bf16.msra.mxu1 %v2863_v10  ;;  %1989 = vmatprep.subr.bf16.mxu0 %v2868_v11 }
 0x157   : > { %2108 = vmatprep.subr.bf16.mxu1 %v2871_v12 }
 0x159   : > { %1990 = vmatpush1.bf16.msra.mxu0 %v2866_v13 }
 0x15a   : > { %2109 = vmatpush1.bf16.msra.mxu1 %v2869_v14  ;;  %1991 = vmatprep.subr.bf16.mxu0 %v2874_v15 }
 0x15b   : > { %2110 = vmatprep.subr.bf16.mxu1 %v2877_v16 }
 0x15d   : > { %1992 = vmatpush1.bf16.msra.mxu0 %v2872_v17 }
 0x15e   : > { %2111 = vmatpush1.bf16.msra.mxu1 %v2875_v18  ;;  %1993 = vmatprep.subr.bf16.mxu0 %v2880_v19 }
 0x15f   : > { %2112 = vmatprep.subr.bf16.mxu1 %v2883_v20 }
 0x161   : > { %1994 = vmatpush1.bf16.msra.mxu0 %v2878_v21 }
 0x162   : > { %2113 = vmatpush1.bf16.msra.mxu1 %v2881_v22  ;;  %1995 = vmatprep.subr.bf16.mxu0 %v2886_v23 }
 0x163   : > { %2114 = vmatprep.subr.bf16.mxu1 %v2889_v25 }
 0x165   : > { %1996 = vmatpush1.bf16.msra.mxu0 %v2884_v26 }
 0x166   : > { %2115 = vmatpush1.bf16.msra.mxu1 %v2887_v27  ;;  %1997 = vmatprep.subr.bf16.mxu0 %v2892_v28 }
 0x167   : > { %2116 = vmatprep.subr.bf16.mxu1 %v2895_v29 }
 0x169   : > { %1998 = vmatpush1.bf16.msra.mxu0 %v2890_v30 }
 0x16a   : > { %2117 = vmatpush1.bf16.msra.mxu1 %v2893_v32  ;;  %1999 = vmatprep.subr.bf16.mxu0 %v2898_v54 }
 0x16b   : > { %2118 = vmatprep.subr.bf16.mxu1 %v2901_v34 }
 0x16d   : > { %2000 = vmatpush1.bf16.msra.mxu0 %v2896_v35 }
 0x16e   : > { %2119 = vmatpush1.bf16.msra.mxu1 %v2899_v9  ;;  %2001 = vmatprep.subr.bf16.mxu0 %v2904_v36 }
 0x16f   : > { %2120 = vmatprep.subr.bf16.mxu1 %v2907_v37 }
 0x171   : > { %2002 = vmatpush1.bf16.msra.mxu0 %v2902_v38 }
 0x172   : > { %2121 = vmatpush1.bf16.msra.mxu1 %v2905_v40 }
 0x173   : > { %2122 = vmatprep.subr.bf16.mxu1 %v2910_v41 }
 0x174   : > { %2004 = vmatmul.mubr.bf16.vlgmr.msra.gmra.mrb[16].mxu0 %v664_v24 }
 0x176   : > { %2123 = vmatpush1.bf16.msra.mxu1 %v2908_v43 }
 0x177   : > { %2124 = vmatprep.subr.bf16.mxu1 %v2913_v6 }
 0x17a   : > { %2125 = vmatpush1.bf16.msra.mxu1 %v2911_v45 }
 0x17b   : > { %2135 = vmatprep.subr.bf16.mxu1 %v2916_v46 }
 0x17d   : > { %2127 = vmatmul.mubr.bf16.vlgmr.msra.gmra.mrb[12].mxu1 %v670_v47 }
 0x17e   : > { %2136 = vmatpush1.bf16.msra.mxu1 %v2914_v33  ;;  %2167 = vmatprep.mubr.bf16.mxu1 %v2996_v2  ;;  %v2923_v2 = vld [vmem:[%s3853_s2 + $0x630] ss:$8 sps:$4 sm:$0xff]  }
 0x17f   : > { %2137 = vmatprep.subr.bf16.mxu1 %v2919_v31 }
 0x182   : > { %2138 = vmatpush1.bf16.msra.mxu1 %v2917_v48 }
 0x183   : > { %2139 = vmatprep.subr.bf16.mxu1 %v2922_v49 }
 0x186   : > { %2140 = vmatpush1.bf16.msra.mxu1 %v2920_v50 }
 0x187   : > { %2141 = vmatprep.subr.bf16.mxu1 %v2925_v51 }
 0x18a   : > { %2142 = vmatpush1.bf16.msra.mxu1 %v2923_v2 }
 0x18d   : > { %2510 = vmatmul.mubr.msk.bf16.vlgmr.msra.gmra.mrb[12].mxu1 %vm1885_vm3, %v672_v53 }
 0x247   : > { %v2005_v55 = vpop.f32.mrb[16].mxu0 }
 0x248   : > { %v2007_v56 = vpop.f32.mrb[17].mxu0  ;;  %v2528_v1 = vadd.f32 %v2005_v55, %v878_v63 }
 0x249   : > { %v2009_v57 = vpop.f32.mrb[18].mxu0  ;;  %v2530_v3 = vadd.f32 %v2007_v56, %v882_v0 }
 0x24a   : > { %v2010_v58 = vpop.f32.mrb[19].mxu0 }
 0x260   : > { %v2169_v4 = vpop.f32.mrb[12].mxu1 }
 0x261   : > { %v2529_v5 = vadd.f32 %v2528_v1, %v2169_v4  ;;  %v2171_v7 = vpop.f32.mrb[13].mxu1 }
 0x262   : > { %v2531_v8 = vadd.f32 %v2530_v3, %v2171_v7  ;;  %v2173_v10 = vpop.f32.mrb[14].mxu1 }
 0x263   : > { %v2174_v11 = vpop.f32.mrb[15].mxu1 }
 0x264   : > { %v2177_v12 = vsel %vm2176_vm4, %v2531_v8, -inf }
 0x265   : > { %v2178_v13 = vmax.f32 %v2529_v5, %v2177_v12 }
 0x267   : > { %2179 = vmax.xlane.f32.xlu0 %v2178_v13 }
 0x2f4   : > { %v2180_v14 = vpop.xlane.xlu0 %2179 }
 0x2f5   : > { %v2181_v15 = vsub.f32 %v2529_v5, %v2180_v14  ;;  %v2182_v16 = vsub.f32 %v2531_v8, %v2180_v14 }
 0x2f7   : > { %v2183_v17 = vmul.f32 1.442695, %v2181_v15  ;;  %v2185_v18 = vmul.f32 1.442695, %v2182_v16 }
 0x2f9   : > { %2926 = vpow2.f32 %v2183_v17 }
 0x2fa   : > { %2928 = vpow2.f32 %v2185_v18 }
 0x303   : > { %v2927_v19 = vpop.eup %2926 }
 0x304   : > { %v2929_v20 = vpop.eup %2928 }
 0x305   : > { %v2187_v21 = vsel %vm2176_vm4, %v2929_v20, 0.0 }
 0x306   : > { %v2188_v22 = vadd.f32 %v2927_v19, %v2187_v21 }
 0x308   : > { %2189 = vadd.xlane.f32.xlu0 %v2188_v22 }
 0x395   : > { %v2190_v23 = vpop.xlane.xlu0 %2189 }
 0x396   : > { %2930 = vrcp.f32 %v2190_v23 }
 0x3a0   : > { %v2931_v25 = vpop.eup %2930 }
 0x3a1   : > { %v2193_v26 = vmul.f32 %v2931_v25, %v2927_v19  ;;  %v2194_v27 = vmul.f32 %v2931_v25, %v2929_v20 }
 0x3a3   : > { %2195 = vst [vmem:[%s188_s9] sm:$0xff] %v2193_v26  ;;  %2196 = vst.msk [vmem:[%s188_s9 + $0x8] sm:$0xff] %vm2176_vm4, %v2194_v27 }
 0x3a4   : > { %2945 = shalt.err (!%p2942_p3)
}
 0x3a5   : > { %s2946_s27 = scalar_lea.hbm %s3808_s13, 256  ;;  %s2950_s30 = scalar_lea.hbm %s3855_s4, 512 }
 0x3a6   : > { %p2947_p4 = scmp.ne.s32.totalorder %s3808_s13, %s2946_s27  ;;  %p2951_p9 = scmp.lt.u32.totalorder %s3808_s13, %s3855_s4 }
 0x3a7   : > { %p2952_p10 = scmp.lt.u32.totalorder %s2950_s30, %s2946_s27  ;;  %p2954_p12 = scmp.lt.u32.totalorder %s2946_s27, %s3808_s13 }
 0x3a8   : > { %p2948_p7 = pnand %p2947_p4, %p3063_p5 }
 0x3a9   : > { %p2953_p11 = por %p2952_p10, %p2951_p9 }
 0x3aa   : > { %p2949_p8 = pneg %p2948_p7 }
 0x3ab   : > { %p2955_p13 = por %p2954_p12, %p2953_p11 }
 0x3ad   : > { %p2956_p0 = pnand %p2955_p13, %p2949_p8 }
 0x3af   : > { %2959 = shalt.err (!%p2956_p0)
}
 0x3b0   : > { %2552 = dma.vmem_to_hbm [thread:$0]  (%p3063_p5), %s3810_s10, 256, %s3808_s13, %s2198_s14  }
 0x3b1 PF: > { %p2558_p1 = scmp.ge.s32.totalorder %s2994_s18, 2  ;;  %s2224_s7 = sand.u32 1, %s2982_s15  }
 0x3b2   : > { %s2225_s8 = scalar_lea.sflag [#allocation3], %s2224_s7 }
 0x3b3   : > { %p2555_p2 = pnand %p2558_p1, %p3067_p6 }
 0x3b5   : > { %2977 = dma.done.wait (!%p2555_p2), %s2225_s8, 256  }
 0x3b6   : > { %2979 = vsyncadd (!%p2555_p2), %s2225_s8, 4294967040  ;;  %p14_p3 = scmp.ge.s32.totalorder %s3050_s21, 4   ;;  %s3858_s15 = smov %s2986_s16 }
 0x3b7   : > { %s3859_s16 = smov %s2990_s17  ;;  %s3860_s17 = smov %s3061_s24 }
 0x3b8   : > { %s3861_s18 = smov %s3050_s21  ;;  %16 = sbr.rel (!%p14_p3) target bundleno = 3 (0x3), region = 71 }
 0x3bf   :  { %2230 = vsyncpa [#allocation3], 1 }
 0x3c0   :  { %2232 = vsyncpa [#allocation3 + $0x1], 1 }

</bundles_post_ra>
